<compile_context>
chip_gen: v5e
topology: v5e:2x2
jax: 0.10.0
libtpu: 0.0.40
codegen_flags: <defaults>
</compile_context>

<pallas_src>
import functools

import jax
import jax.numpy as jnp
from jax.experimental import pallas as pl
from jax.experimental.pallas import tpu as pltpu


def _chan_sum_kernel(x_ref, out_ref, *, hw, flat_tile, needs_mask):
    """Accumulate per-channel sums of a lane-dense activation tile.

    x_ref  : (1, C, flat_tile) tile of the (N, C, H*W)-flattened activation
    out_ref: (1, C, 1) per-image per-channel accumulator (resident across the
             flat-spatial grid axis)
    """
    t = pl.program_id(1)

    @pl.when(t == 0)
    def _init():
        out_ref[...] = jnp.zeros_like(out_ref)

    x = x_ref[0].astype(jnp.float32)                      # (C, F)
    if needs_mask:
        # Last tile may extend past H*W: zero the padded (undefined) lanes.
        pos = jax.lax.broadcasted_iota(jnp.int32, x.shape, 1)
        x = jnp.where(pos < hw - t * flat_tile, x, 0.0)
    # Minor-axis reduce: elementwise (VALU) accumulation across lane-tiles,
    # one cross-lane collapse per 8 channels per tile -> stays HBM-bound.
    s = jnp.sum(x, axis=-1, keepdims=True)                # (C, 1)
    out_ref[...] += s[None]                               # (1, C, 1)


def _round_up(a, b):
    return -(-a // b) * b


def _pick_flat_tile(hw, c, itemsize, budget_bytes=12 << 20):
    """Largest lane-dense tile (multiple of 128 on the flat axis) whose real
    VMEM footprint (sublane-padded channels x lanes) fits the budget."""
    c_pad = _round_up(max(c, 1), 8)
    f = budget_bytes // (c_pad * max(itemsize, 1))
    f = max(128, (f // 128) * 128)
    if hw <= f:
        return hw          # one full block; no 128-multiple requirement
    return f


@functools.partial(jax.jit, static_argnames=("flat_tile",))
def lbp_discriminator_forward(x, w_dw, b_dw, w_1x1, b_1x1, w_proj, b_proj,
                              flat_tile=None):
    """x: (N, C, H, W) -> (N, 1, 1, 1), matching the PyTorch module."""
    N, C, H, W = x.shape
    HW = H * W

    # ---- fold the linear tail (1x1 conv -> avg-pool -> 1x1 project) ----
    wdw = w_dw[:, 0, :, :].astype(jnp.float32)            # (C, 3, 3)
    w1 = w_1x1[:, :, 0, 0].astype(jnp.float32)            # (C2, C)
    wp = w_proj[0, :, 0, 0].astype(jnp.float32)           # (C2,)
    wfold = wp @ w1                                        # (C,) = project o 1x1
    bias = (jnp.sum(wfold * b_dw.astype(jnp.float32))
            + jnp.dot(wp, b_1x1.astype(jnp.float32))
            + b_proj.astype(jnp.float32)[0])
    g = wfold / float(HW)                                  # folds avg-pool 1/(HW)

    # Inclusion/exclusion coefficients for the zero-padded 3x3 depthwise conv.
    cf_total = g * wdw.sum(axis=(1, 2))
    cf_top   = -g * wdw[:, 2, :].sum(axis=1)               # row 0 excluded (ky=2)
    cf_bot   = -g * wdw[:, 0, :].sum(axis=1)               # last row excluded
    cf_left  = -g * wdw[:, :, 2].sum(axis=1)               # col 0 excluded (kx=2)
    cf_right = -g * wdw[:, :, 0].sum(axis=1)               # last col excluded
    cf_tl, cf_tr = g * wdw[:, 2, 2], g * wdw[:, 2, 0]
    cf_bl, cf_br = g * wdw[:, 0, 2], g * wdw[:, 0, 0]

    # ---- bulk term: lane-dense streaming per-channel sums (Pallas) ----
    if flat_tile is None:
        ft = _pick_flat_tile(HW, C, x.dtype.itemsize)
    else:
        ft = int(flat_tile)
        if ft != HW and ft % 128 != 0:
            raise ValueError("flat_tile must equal H*W or be a multiple of 128")
    n_t = pl.cdiv(HW, ft)
    x_flat = x.reshape(N, C, HW)                           # free view (contiguous)

    kernel = functools.partial(_chan_sum_kernel, hw=HW, flat_tile=ft,
                               needs_mask=(HW % ft != 0))
    s_total = pl.pallas_call(
        kernel,
        out_shape=jax.ShapeDtypeStruct((N, C, 1), jnp.float32),
        grid_spec=pltpu.PrefetchScalarGridSpec(
            num_scalar_prefetch=0,
            grid=(N, n_t),
            in_specs=[pl.BlockSpec((1, C, ft), lambda n, t: (n, 0, t))],
            out_specs=pl.BlockSpec((1, C, 1), lambda n, t: (n, 0, 0))),
        compiler_params=pltpu.CompilerParams(
            dimension_semantics=("parallel", "arbitrary"),
            vmem_limit_bytes=30 << 20),
    )(x_flat)[:, :, 0]                                     # (N, C)

    # ---- boundary terms: tiny O(C*(H+W)) slices, plain XLA ----
    top = x[:, :, 0, :].astype(jnp.float32)                # (N, C, W)
    bot = x[:, :, H - 1, :].astype(jnp.float32)            # (N, C, W)
    left = x[:, :, :, 0].astype(jnp.float32)               # (N, C, H)
    right = x[:, :, :, W - 1].astype(jnp.float32)          # (N, C, H)
    s_top, s_bot = top.sum(-1), bot.sum(-1)
    s_left, s_right = left.sum(-1), right.sum(-1)
    tl, tr = top[:, :, 0], top[:, :, W - 1]
    bl, br = bot[:, :, 0], bot[:, :, W - 1]

    out = (s_total @ cf_total + s_top @ cf_top + s_bot @ cf_bot
           + s_left @ cf_left + s_right @ cf_right
           + tl @ cf_tl + tr @ cf_tr + bl @ cf_bl + br @ cf_br + bias)
    return out.reshape(N, 1, 1, 1)


def _reference_forward(x, w_dw, b_dw, w_1x1, b_1x1, w_proj, b_proj):
    """Pure-JAX reference (unfused path) for correctness checking."""
    N, C, H, W = x.shape
    xf = x.astype(jnp.float32)
    wdw = w_dw[:, 0, :, :].astype(jnp.float32)             # (C, 3, 3)
    xp = jnp.pad(xf, ((0, 0), (0, 0), (1, 1), (1, 1)))
    acc = jnp.zeros_like(xf)
    for ky in range(3):
        for kx in range(3):
            acc = acc + (xp[:, :, ky:ky + H, kx:kx + W]
                         * wdw[:, ky, kx][None, :, None, None])
    acc = acc + b_dw.astype(jnp.float32)[None, :, None, None]
    w1 = w_1x1[:, :, 0, 0].astype(jnp.float32)             # (C2, C)
    y = (jnp.einsum('nchw,dc->ndhw', acc, w1)
         + b_1x1.astype(jnp.float32)[None, :, None, None])
    pooled = jnp.mean(y, axis=(2, 3))                      # (N, C2)
    wp = w_proj[:, :, 0, 0].astype(jnp.float32)            # (1, C2)
    out = pooled @ wp.T + b_proj.astype(jnp.float32)       # (N, 1)
    return out.reshape(N, 1, 1, 1)


if __name__ == "__main__":
    N, C, H, W = 2, 4, 16, 16
    C2 = C // 2

    key = jax.random.PRNGKey(0)
    ks = jax.random.split(key, 8)
    x = jax.random.normal(ks[0], (N, C, H, W), jnp.float32)

    # Parameter shapes exactly as in the PyTorch module's __init__.
    w_dw = jax.random.normal(ks[1], (C, 1, 3, 3), jnp.float32) * 0.2
    b_dw = jax.random.normal(ks[2], (C,), jnp.float32) * 0.1
    w_1x1 = jax.random.normal(ks[3], (C2, C, 1, 1), jnp.float32) * 0.2
    b_1x1 = jax.random.normal(ks[4], (C2,), jnp.float32) * 0.1
    w_proj = jax.random.normal(ks[5], (1, C2, 1, 1), jnp.float32) * 0.2
    b_proj = jax.random.normal(ks[6], (1,), jnp.float32) * 0.1
    params = (w_dw, b_dw, w_1x1, b_1x1, w_proj, b_proj)

    ref = _reference_forward(x, *params)

    # 1) Default tiling: H*W = 256 fits a single lane-dense block.
    out = jax.block_until_ready(lbp_discriminator_forward(x, *params))
    assert out.shape == (N, 1, 1, 1), out.shape
    assert jnp.allclose(out, ref, atol=2e-4, rtol=2e-4), (out, ref)

    # 2) Forced 128-wide flat tiles (2 exact tiles) -> exercises accumulation.
    out_t = jax.block_until_ready(
        lbp_discriminator_forward(x, *params, flat_tile=128))
    assert jnp.allclose(out_t, ref, atol=2e-4, rtol=2e-4), (out_t, ref)

    # 3) Ragged spatial size (H*W = 240, not a multiple of 128) -> exercises
    #    the masked partial last tile.
    x2 = jax.random.normal(ks[7], (N, C, 12, 20), jnp.float32)
    ref2 = _reference_forward(x2, *params)
    out2 = jax.block_until_ready(
        lbp_discriminator_forward(x2, *params, flat_tile=128))
    assert jnp.allclose(out2, ref2, atol=2e-4, rtol=2e-4), (out2, ref2)

    print("KERNEL_OK")
</pallas_src>

<mosaic_0001>
module attributes {stable_mosaic.version = 11 : i64} {
  func.func @_chan_sum_kernel(%arg0: i32, %arg1: i32, %arg2: memref<1x4x256xf32, #tpu.memory_space<vmem>>, %arg3: memref<1x4x1xf32, #tpu.memory_space<vmem>>) attributes {dimension_semantics = [#tpu.dimension_semantics<parallel>, #tpu.dimension_semantics<arbitrary>], iteration_bounds = array<i64: 2, 1>, scalar_prefetch = 0 : i64, scratch_operands = 0 : i64, tpu.core_type = #tpu.core_type<tc>, window_params = [{transform_indices = @transform_0, window_bounds = array<i64: 1, 4, 256>}, {transform_indices = @transform_1, window_bounds = array<i64: 1, 4, 1>}]} {
    %c0_i32 = arith.constant 0 : i32
    %0 = arith.cmpi eq, %arg1, %c0_i32 : i32
    %1 = arith.extui %0 : i1 to i32
    %c0_i32_0 = arith.constant 0 : i32
    %2 = arith.cmpi ne, %1, %c0_i32_0 : i32
    scf.if %2 {
      %cst_9 = arith.constant 0.000000e+00 : f32
      %11 = vector.broadcast %cst_9 : f32 to vector<1x4x1xf32>
      %c0_10 = arith.constant 0 : index
      %c0_11 = arith.constant 0 : index
      %c0_12 = arith.constant 0 : index
      %12 = vector.load %arg3[%c0_10, %c0_11, %c0_12] : memref<1x4x1xf32, #tpu.memory_space<vmem>>, vector<1x4x1xf32>
      tpu.vector_store %arg3[%c0_10, %c0_11, %c0_12], %11 {strides = array<i32>} : memref<1x4x1xf32, #tpu.memory_space<vmem>>, vector<1x4x1xf32>,
    } else {
    }
    %c0 = arith.constant 0 : index
    %c0_1 = arith.constant 0 : index
    %c0_2 = arith.constant 0 : index
    %3 = vector.load %arg2[%c0, %c0_1, %c0_2] : memref<1x4x256xf32, #tpu.memory_space<vmem>>, vector<1x4x256xf32>
    %4 = vector.shape_cast %3 : vector<1x4x256xf32> to vector<4x256xf32>
    %cst = arith.constant dense<0.000000e+00> : vector<4xf32>
    %5 = vector.multi_reduction <add>, %4, %cst [1] : vector<4x256xf32> to vector<4xf32>
    %6 = vector.shape_cast %5 : vector<4xf32> to vector<4x1xf32>
    %c0_3 = arith.constant 0 : index
    %c0_4 = arith.constant 0 : index
    %c0_5 = arith.constant 0 : index
    %7 = vector.load %arg3[%c0_3, %c0_4, %c0_5] : memref<1x4x1xf32, #tpu.memory_space<vmem>>, vector<1x4x1xf32>
    %8 = vector.shape_cast %6 : vector<4x1xf32> to vector<1x4x1xf32>
    %9 = arith.addf %7, %8 : vector<1x4x1xf32>
    %c0_6 = arith.constant 0 : index
    %c0_7 = arith.constant 0 : index
    %c0_8 = arith.constant 0 : index
    %10 = vector.load %arg3[%c0_6, %c0_7, %c0_8] : memref<1x4x1xf32, #tpu.memory_space<vmem>>, vector<1x4x1xf32>
    tpu.vector_store %arg3[%c0_6, %c0_7, %c0_8], %9 {strides = array<i32>} : memref<1x4x1xf32, #tpu.memory_space<vmem>>, vector<1x4x1xf32>,
    return
  }
  func.func @transform_0(%arg0: i32, %arg1: i32) -> (i32, i32, i32) {
    %c0_i32 = arith.constant 0 : i32
    %c0_i32_0 = arith.constant 0 : i32
    return %arg0, %c0_i32, %arg1 : i32, i32, i32
  }
  func.func @transform_1(%arg0: i32, %arg1: i32) -> (i32, i32, i32) {
    %c0_i32 = arith.constant 0 : i32
    %c0_i32_0 = arith.constant 0 : i32
    %c0_i32_1 = arith.constant 0 : i32
    return %arg0, %c0_i32, %c0_i32_0 : i32, i32, i32
  }
}

</mosaic_0001>

<bundles_post_ra>
// kernel: lbp_discriminator_forward.1
= control target key start
LH: loop header
LB: loop body
LE: loop exit
PB: predicated region body
PF: predicated region fallthrough
CT: control target
= control target key end

     0   :  { %s304_s6 = smov 0   ;;  %s306_s7 = smov 0   ;;  %s336_s0 = inlined_call_operand.vmem [shape: f32[2,4,256], index: 0, kind: input, shape index: {}]   ;;  %s337_s1 = inlined_call_operand.vmem [shape: f32[2,4,1], index: 1, kind: output, shape index: {}]  }
   0x1   :  { %s308_s8 = smov 0  }
   0x2 LB: > { %s23_s9 = sadd.s32 1, %s287_s7  ;;  %p237_p0 = scmp.ge.s32.totalorder %s291_s8, 1  ;;  %s291_s8 = sphi %s308_s8, %s11_s8   ;;  %s287_s7 = sphi %s306_s7, %s339_s7   ;;  %s283_s6 = sphi %s304_s6, %s338_s6  }
   0x3   : > { %p25_p1 = scmp.ge.s32.totalorder %s23_s9, 2  ;;  %p106_p2 = scmp.lt.s32.totalorder %s291_s8, 3 }
   0x5   : > { %s341_s9 = smov (%p25_p1, %s23_s9), 0  ;;  %p107_p3 = pnand %p237_p0, %p106_p2 }
   0x6   : > { %p130_p4 = scmp.lt.s32.totalorder (!%p107_p3), %s283_s6, 1 }
   0x7   : > { %110 = sbr.rel (%p107_p3) target bundleno = 146 (0x92), region = 24 }
   0xc   : > { %s343_s6 = smov (!%p130_p4, %s283_s6), 1  ;;  %vm147_vm0 = vcmask 3072   ;;  %v293_v1 = vmov 0.0   ;;  %vm156_vm1 = vcmask 1043456  }
   0xd   : > { %s243_s10 = sshll.u32 %s343_s6, 3  ;;  %s240_s11 = sshll.u32 %s343_s6, 2 }
   0xe   : > { %s137_s14 = scalar_lea.vmem %s336_s0, %s243_s10  ;;  %s142_s17 = scalar_lea.vmem %s337_s1, %s240_s11 }
   0xf   : > { %v149_v0 = vld [vmem:[%s137_s14] sm:$0xff]  ;;  %148 = vst.msk [vmem:[%s142_s17] sm:$0xf] %vm147_vm0, %v293_v1 }
  0x10   : > { %151 = vst [vmem:[#allocation1] ss:$2 sm:$0xff] %v149_v0 }
  0x16   : > { %v162_v7 = vld [vmem:[%s142_s17] sm:$0xf] }
  0x17   : > { %v152_v2 = vld.sshfl [vmem:[#allocation1] sm:$0xff pattern:$0x75316420]  ;;  %v153_v3 = vld.sshfl [vmem:[#allocation1 + $0x8] sm:$0xff pattern:$0x75316420] }
  0x18   : > { %v157_v4 = vsel %vm156_vm1, %v152_v2, 0.0  ;;  %v158_v5 = vsel %vm156_vm1, %v153_v3, 0.0 }
  0x19   : > { %v159_v6 = vadd.f32 %v158_v5, %v157_v4 }
  0x1b   : > { %160 = vadd.xlane.f32.xlu0 %v159_v6 }
  0x8e   : > { %v161_v8 = vpop.xlane.xlu0 %160 }
  0x8f   : > { %v163_v9 = vadd.f32 %v162_v7, %v161_v8 }
  0x91   : > { %165 = vst.msk [vmem:[%s142_s17] sm:$0xf] %vm147_vm0, %v163_v9 }
  0x92 PF: > { %s11_s8 = sadd.s32 1, %s291_s8   ;;  %s338_s6 = smov %s287_s7 }
  0x93   : > { %p8_p5 = scmp.ge.s32.totalorder %s11_s8, 4   ;;  %s339_s7 = smov %s341_s9 }
  0x95   :  { %10 = sbr.rel (!%p8_p5) target bundleno = 2 (0x2), region = 58 }

</bundles_post_ra>
